<compile_context>
chip_gen: v5e
topology: v5e:2x2
jax: 0.10.0
libtpu: 0.0.40
codegen_flags: <defaults>
</compile_context>

<pallas_src>
import math

import numpy as np
import jax
import jax.numpy as jnp
from jax.experimental import pallas as pl
from jax.experimental.pallas import tpu as pltpu


# ----------------------------------------------------------------------------
# Separable bicubic (a = -0.5, antialias) resampling matrices, matching
# torch::_upsample_bicubic2d_aa.  Built in float64, cast at the end.
# ----------------------------------------------------------------------------
def _cubic(x, a=-0.5):
    x = np.abs(x)
    p1 = ((a + 2.0) * x - (a + 3.0)) * x * x + 1.0           # |x| < 1
    p2 = (((x - 5.0) * x + 8.0) * x - 4.0) * a                # 1 <= |x| < 2
    return np.where(x < 1.0, p1, np.where(x < 2.0, p2, 0.0))


def _resize_matrix(in_size, out_size):
    """Dense (out_size, in_size) weight matrix matching torch's aa bicubic."""
    scale = in_size / out_size
    filterscale = max(scale, 1.0)
    support = 2.0 * filterscale
    mat = np.zeros((out_size, in_size), dtype=np.float64)
    for i in range(out_size):
        center = (i + 0.5) * scale
        lo = max(0, int(center - support + 0.5))
        hi = min(in_size, int(center + support + 0.5))
        idx = np.arange(lo, hi, dtype=np.float64)
        w = _cubic((idx - center + 0.5) / filterscale)
        s = w.sum()
        if s != 0.0:
            w = w / s
        mat[i, lo:hi] = w
    return mat


def _block_diag(mat, reps):
    """np block-diagonal: reps copies of mat along the diagonal."""
    if reps == 1:
        return mat
    r, c = mat.shape
    out = np.zeros((reps * r, reps * c), dtype=mat.dtype)
    for j in range(reps):
        out[j * r:(j + 1) * r, j * c:(j + 1) * c] = mat
    return out


# ----------------------------------------------------------------------------
# Device introspection (robust: conservative defaults if a query fails).
# ----------------------------------------------------------------------------
def _tpu_vmem_bytes():
    try:
        cap = int(pltpu.get_tpu_info().vmem_capacity_bytes)
        if cap > 0:
            return cap
    except Exception:
        pass
    return 64 * 1024 * 1024      # conservative default: v7x per-TensorCore VMEM


def _num_tensorcores():
    try:
        dev = jax.devices()[0]
        for attr in ("num_cores", "core_count"):
            v = getattr(dev, attr, None)
            if isinstance(v, int) and 0 < v <= 16:
                return v
        if "v7" in str(getattr(dev, "device_kind", "")).lower():
            return 2
    except Exception:
        pass
    return 1


# ----------------------------------------------------------------------------
# Tiling: planes per grid step, VMEM- and generation-aware.
# ----------------------------------------------------------------------------
def _step_vmem_bytes(tb, h_in, w_in, h_out, w_out, in_bytes, out_bytes, w_bytes):
    """Rough per-grid-step VMEM footprint: double-buffered I/O blocks, weights
    (worst-case double-buffered), f32 intermediates."""
    inp = 2 * h_in * (tb * w_in) * in_bytes
    outp = 2 * h_out * (tb * w_out) * out_bytes
    ah = 2 * h_out * h_in * w_bytes
    awt = 2 * (tb * w_in) * (tb * w_out) * w_bytes
    inter = h_out * (tb * w_in) * (4 + w_bytes) + h_out * (tb * w_out) * 4
    return inp + outp + ah + awt + inter


def _choose_tb(batch, h_in, w_in, h_out, w_out, in_bytes, out_bytes, w_bytes,
               vmem_budget, num_cores):
    """Planes per grid step.  Lane-aligned blocks ((tb*w) % 128 == 0 or full
    array), within the VMEM budget, block-diagonal W-pass K capped at ~512,
    >=2 steps per TensorCore on multi-core parts, fewest steps otherwise."""
    def lane_ok(d):
        return (((d * w_in) % 128 == 0) or d == batch) and \
               (((d * w_out) % 128 == 0) or d == batch)

    cands = [d for d in range(1, batch + 1) if batch % d == 0 and lane_ok(d)]
    fits = [d for d in cands
            if _step_vmem_bytes(d, h_in, w_in, h_out, w_out,
                                in_bytes, out_bytes, w_bytes) <= vmem_budget]
    if not fits:
        # Nothing fits the budget: take the smallest legal tile and let
        # vmem_limit_bytes stretch.
        # TODO(synk): banded H_out/W_out tiling for very large planes.
        return min(cands)

    # Bound the block-diagonal waste (K of the W-pass) when possible.
    pool = [d for d in fits if d * w_in <= 512]
    if not pool:
        pool = [min(fits)]

    if num_cores > 1:
        for min_steps in (2 * num_cores, num_cores):
            pref = [d for d in pool if batch // d >= min_steps]
            if pref:
                return max(pref)
    return max(pool)


# ----------------------------------------------------------------------------
# Pallas kernel: one grid step = two large lane-dense MXU matmuls, no relayout.
# ----------------------------------------------------------------------------
def _bicubic_kernel(x_ref, ah_ref, awt_ref, o_ref):
    cdt = ah_ref.dtype                          # bf16 fast path keeps bf16 operands
    x = x_ref[...].astype(cdt)                  # (H_in, tb*W_in)
    # Height pass: one lane-dense matmul covering all tb planes at once.
    y = jnp.dot(ah_ref[...], x, preferred_element_type=jnp.float32)      # (H_out, tb*W_in)
    # Width pass against the block-diagonal A_w^T: plane batch folded into the
    # matmul K/N dims, so no per-plane slicing / concat / relayout anywhere.
    z = jnp.dot(y.astype(cdt), awt_ref[...], preferred_element_type=jnp.float32)
    o_ref[...] = z.astype(o_ref.dtype)          # (H_out, tb*W_out)


# ----------------------------------------------------------------------------
# Wrapper
# ----------------------------------------------------------------------------
def bicubic_upsample(x, upscale_factor):
    """x: (N, C, H, W) -> (N, C, floor(H*s), floor(W*s)); bicubic,
    align_corners=False, antialias=True (PyTorch semantics)."""
    n, c, h_in, w_in = x.shape
    h_out = int(math.floor(h_in * upscale_factor))
    w_out = int(math.floor(w_in * upscale_factor))
    batch = n * c

    # bf16 fast path on the MXU; otherwise compute in f32.  Accumulation is f32
    # in both cases (preferred_element_type inside the kernel).
    cdt = jnp.bfloat16 if x.dtype == jnp.bfloat16 else jnp.float32
    w_bytes = np.dtype(cdt).itemsize
    in_bytes = np.dtype(x.dtype).itemsize
    out_bytes = in_bytes

    ah_np = _resize_matrix(h_in, h_out)          # (H_out, H_in)  float64
    awt_np = _resize_matrix(w_in, w_out).T       # (W_in,  W_out) float64

    vmem_cap = _tpu_vmem_bytes()
    n_cores = _num_tensorcores()
    vmem_budget = int(0.65 * vmem_cap)

    tb = _choose_tb(batch, h_in, w_in, h_out, w_out,
                    in_bytes, out_bytes, w_bytes, vmem_budget, n_cores)
    grid = (batch // tb,)

    ah = jnp.asarray(ah_np, dtype=cdt)                        # (H_out, H_in)
    awt_bd = jnp.asarray(_block_diag(awt_np, tb), dtype=cdt)  # (tb*W_in, tb*W_out)

    # Lane-dense input layout: (H_in, B*W_in); plane b occupies columns
    # [b*W_in, (b+1)*W_in).  (Transpose of the small, pre-upsample side.)
    x2 = jnp.transpose(x.reshape(batch, h_in, w_in), (1, 0, 2)).reshape(h_in, batch * w_in)

    need = _step_vmem_bytes(tb, h_in, w_in, h_out, w_out, in_bytes, out_bytes, w_bytes)
    vmem_limit = int(min(max(need + (8 << 20), 32 << 20), int(0.9 * vmem_cap)))

    flops = int(2 * h_out * h_in * batch * w_in
                + 2 * (batch // tb) * h_out * (tb * w_in) * (tb * w_out))
    bytes_accessed = int(batch * h_in * w_in * in_bytes
                         + batch * h_out * w_out * out_bytes
                         + (h_out * h_in + (tb * w_in) * (tb * w_out)) * w_bytes)
    cost = pl.CostEstimate(flops=flops, transcendentals=0, bytes_accessed=bytes_accessed)

    def run(single_buffer_weights):
        def weight_spec(shape):
            if single_buffer_weights:
                # Constant index_map -> one resident buffer is enough.
                return pl.BlockSpec(shape, lambda i: (0, 0), pipeline_mode=pl.Buffered(1))
            return pl.BlockSpec(shape, lambda i: (0, 0))

        return pl.pallas_call(
            _bicubic_kernel,
            out_shape=jax.ShapeDtypeStruct((h_out, batch * w_out), x.dtype),
            grid=grid,
            in_specs=[
                pl.BlockSpec((h_in, tb * w_in), lambda i: (0, i)),   # tb planes, lane-dense
                weight_spec((h_out, h_in)),                          # A_h (shared)
                weight_spec((tb * w_in, tb * w_out)),                # blockdiag(A_w^T) (shared)
            ],
            out_specs=pl.BlockSpec((h_out, tb * w_out), lambda i: (0, i)),
            compiler_params=pltpu.CompilerParams(
                dimension_semantics=("parallel",),
                vmem_limit_bytes=vmem_limit),
            cost_estimate=cost,
        )(x2, ah, awt_bd)

    try:
        out2d = run(True)
    except Exception:
        # Single-buffered weights (pl.Buffered(1)) are an optimization only;
        # fall back to default double-buffering if unsupported.
        out2d = run(False)

    # Undo the lane-dense layout: (H_out, B*W_out) -> (N, C, H_out, W_out).
    out = jnp.transpose(out2d.reshape(h_out, batch, w_out), (1, 0, 2))
    return out.reshape(n, c, h_out, w_out)


if __name__ == "__main__":
    # Bicubic module has no learnable parameters; only the upscale factor.
    upscale_factor = 2
    key = jax.random.PRNGKey(0)
    x = jax.random.normal(key, (2, 4, 16, 16), dtype=jnp.float32)

    y = bicubic_upsample(x, upscale_factor)
    jax.block_until_ready(y)

    assert y.shape == (2, 4, 32, 32), y.shape
    assert y.dtype == x.dtype

    # Cross-check against the same separable formulation evaluated by XLA.
    n, c, h_in, w_in = x.shape
    h_out = int(math.floor(h_in * upscale_factor))
    w_out = int(math.floor(w_in * upscale_factor))
    ah_ref = jnp.asarray(_resize_matrix(h_in, h_out), dtype=jnp.float32)
    awt_ref = jnp.asarray(_resize_matrix(w_in, w_out).T, dtype=jnp.float32)
    ref = jnp.einsum("oi,ncij,jp->ncop", ah_ref, x.astype(jnp.float32), awt_ref,
                     precision=jax.lax.Precision.HIGHEST)
    err = float(jnp.max(jnp.abs(y.astype(jnp.float32) - ref)))
    assert err < 1e-3, err

    # bf16 fast-path smoke test (looser tolerance: bf16 weights/activations).
    yb = bicubic_upsample(x.astype(jnp.bfloat16), upscale_factor)
    jax.block_until_ready(yb)
    assert yb.dtype == jnp.bfloat16 and yb.shape == (2, 4, 32, 32)
    errb = float(jnp.max(jnp.abs(yb.astype(jnp.float32) - ref)))
    assert errb < 1.5e-1, errb

    print("KERNEL_OK")
</pallas_src>

<mosaic_0001>
module attributes {stable_mosaic.version = 11 : i64} {
  func.func @_bicubic_kernel(%arg0: i32, %arg1: memref<16x128xf32, #tpu.memory_space<vmem>>, %arg2: memref<32x16xf32, #tpu.memory_space<vmem>>, %arg3: memref<128x256xf32, #tpu.memory_space<vmem>>, %arg4: memref<32x256xf32, #tpu.memory_space<vmem>>) attributes {dimension_semantics = [#tpu.dimension_semantics<parallel>], iteration_bounds = array<i64: 1>, scalar_prefetch = 0 : i64, scratch_operands = 0 : i64, tpu.core_type = #tpu.core_type<tc>, window_params = [{transform_indices = @transform_0, window_bounds = array<i64: 16, 128>}, {pipeline_mode = #tpu.pipeline_mode<synchronous>, transform_indices = @transform_1, window_bounds = array<i64: 32, 16>}, {pipeline_mode = #tpu.pipeline_mode<synchronous>, transform_indices = @transform_2, window_bounds = array<i64: 128, 256>}, {transform_indices = @transform_3, window_bounds = array<i64: 32, 256>}]} {
    %c0 = arith.constant 0 : index
    %c0_0 = arith.constant 0 : index
    %0 = vector.load %arg1[%c0, %c0_0] : memref<16x128xf32, #tpu.memory_space<vmem>>, vector<16x128xf32>
    %c0_1 = arith.constant 0 : index
    %c0_2 = arith.constant 0 : index
    %1 = vector.load %arg2[%c0_1, %c0_2] : memref<32x16xf32, #tpu.memory_space<vmem>>, vector<32x16xf32>
    %cst = arith.constant dense<0.000000e+00> : vector<32x128xf32>
    %2 = tpu.matmul %1, %0, %cst {dimension_numbers = #tpu.dot_dimension_numbers<[1], [0], [0], [1], [0, 0, 1, 1], [], []>} : vector<32x16xf32>, vector<16x128xf32>, vector<32x128xf32> -> vector<32x128xf32>
    %c0_3 = arith.constant 0 : index
    %c0_4 = arith.constant 0 : index
    %3 = vector.load %arg3[%c0_3, %c0_4] : memref<128x256xf32, #tpu.memory_space<vmem>>, vector<128x256xf32>
    %cst_5 = arith.constant dense<0.000000e+00> : vector<32x256xf32>
    %4 = tpu.matmul %2, %3, %cst_5 {dimension_numbers = #tpu.dot_dimension_numbers<[1], [0], [0], [1], [0, 0, 1, 1], [], []>} : vector<32x128xf32>, vector<128x256xf32>, vector<32x256xf32> -> vector<32x256xf32>
    %c0_6 = arith.constant 0 : index
    %c0_7 = arith.constant 0 : index
    %5 = vector.load %arg4[%c0_6, %c0_7] : memref<32x256xf32, #tpu.memory_space<vmem>>, vector<32x256xf32>
    tpu.vector_store %arg4[%c0_6, %c0_7], %4 {strides = array<i32>} : memref<32x256xf32, #tpu.memory_space<vmem>>, vector<32x256xf32>,
    return
  }
  func.func @transform_0(%arg0: i32) -> (i32, i32) {
    %c0_i32 = arith.constant 0 : i32
    %c0_i32_0 = arith.constant 0 : i32
    return %c0_i32, %arg0 : i32, i32
  }
  func.func @transform_1(%arg0: i32) -> (i32, i32) {
    %c0_i32 = arith.constant 0 : i32
    %c0_i32_0 = arith.constant 0 : i32
    %c0_i32_1 = arith.constant 0 : i32
    return %c0_i32, %c0_i32_0 : i32, i32
  }
  func.func @transform_2(%arg0: i32) -> (i32, i32) {
    %c0_i32 = arith.constant 0 : i32
    %c0_i32_0 = arith.constant 0 : i32
    %c0_i32_1 = arith.constant 0 : i32
    return %c0_i32, %c0_i32_0 : i32, i32
  }
  func.func @transform_3(%arg0: i32) -> (i32, i32) {
    %c0_i32 = arith.constant 0 : i32
    %c0_i32_0 = arith.constant 0 : i32
    return %c0_i32, %arg0 : i32, i32
  }
}

module attributes {stable_mosaic.version = 11 : i64} {
  func.func @_bicubic_kernel(%arg0: i32, %arg1: memref<16x128xf32, #tpu.memory_space<vmem>>, %arg2: memref<32x16xf32, #tpu.memory_space<vmem>>, %arg3: memref<128x256xf32, #tpu.memory_space<vmem>>, %arg4: memref<32x256xf32, #tpu.memory_space<vmem>>) attributes {dimension_semantics = [#tpu.dimension_semantics<parallel>], iteration_bounds = array<i64: 1>, scalar_prefetch = 0 : i64, scratch_operands = 0 : i64, tpu.core_type = #tpu.core_type<tc>, window_params = [{transform_indices = @transform_0, window_bounds = array<i64: 16, 128>}, {pipeline_mode = #tpu.pipeline_mode<synchronous>, transform_indices = @transform_1, window_bounds = array<i64: 32, 16>}, {pipeline_mode = #tpu.pipeline_mode<synchronous>, transform_indices = @transform_2, window_bounds = array<i64: 128, 256>}, {transform_indices = @transform_3, window_bounds = array<i64: 32, 256>}]} {
    %c0 = arith.constant 0 : index
    %c0_0 = arith.constant 0 : index
    %0 = vector.load %arg1[%c0, %c0_0] : memref<16x128xf32, #tpu.memory_space<vmem>>, vector<16x128xf32>
    %c0_1 = arith.constant 0 : index
    %c0_2 = arith.constant 0 : index
    %1 = vector.load %arg2[%c0_1, %c0_2] : memref<32x16xf32, #tpu.memory_space<vmem>>, vector<32x16xf32>
    %cst = arith.constant dense<0.000000e+00> : vector<32x128xf32>
    %2 = tpu.matmul %1, %0, %cst {dimension_numbers = #tpu.dot_dimension_numbers<[1], [0], [0], [1], [0, 0, 1, 1], [], []>} : vector<32x16xf32>, vector<16x128xf32>, vector<32x128xf32> -> vector<32x128xf32>
    %c0_3 = arith.constant 0 : index
    %c0_4 = arith.constant 0 : index
    %3 = vector.load %arg3[%c0_3, %c0_4] : memref<128x256xf32, #tpu.memory_space<vmem>>, vector<128x256xf32>
    %cst_5 = arith.constant dense<0.000000e+00> : vector<32x256xf32>
    %4 = tpu.matmul %2, %3, %cst_5 {dimension_numbers = #tpu.dot_dimension_numbers<[1], [0], [0], [1], [0, 0, 1, 1], [], []>} : vector<32x128xf32>, vector<128x256xf32>, vector<32x256xf32> -> vector<32x256xf32>
    %c0_6 = arith.constant 0 : index
    %c0_7 = arith.constant 0 : index
    %5 = vector.load %arg4[%c0_6, %c0_7] : memref<32x256xf32, #tpu.memory_space<vmem>>, vector<32x256xf32>
    tpu.vector_store %arg4[%c0_6, %c0_7], %4 {strides = array<i32>} : memref<32x256xf32, #tpu.memory_space<vmem>>, vector<32x256xf32>,
    return
  }
  func.func @transform_0(%arg0: i32) -> (i32, i32) {
    %c0_i32 = arith.constant 0 : i32
    %c0_i32_0 = arith.constant 0 : i32
    return %c0_i32, %arg0 : i32, i32
  }
  func.func @transform_1(%arg0: i32) -> (i32, i32) {
    %c0_i32 = arith.constant 0 : i32
    %c0_i32_0 = arith.constant 0 : i32
    %c0_i32_1 = arith.constant 0 : i32
    return %c0_i32, %c0_i32_0 : i32, i32
  }
  func.func @transform_2(%arg0: i32) -> (i32, i32) {
    %c0_i32 = arith.constant 0 : i32
    %c0_i32_0 = arith.constant 0 : i32
    %c0_i32_1 = arith.constant 0 : i32
    return %c0_i32, %c0_i32_0 : i32, i32
  }
  func.func @transform_3(%arg0: i32) -> (i32, i32) {
    %c0_i32 = arith.constant 0 : i32
    %c0_i32_0 = arith.constant 0 : i32
    return %c0_i32, %arg0 : i32, i32
  }
}

</mosaic_0001>

<bundles_post_ra>
// kernel: tpu_custom_call.1
= control target key start
LH: loop header
LB: loop body
LE: loop exit
PB: predicated region body
PF: predicated region fallthrough
CT: control target
= control target key end

     0   :  { %8 = vsyncpa [#allocation3], 0  ;;  %s346_s0 = inlined_call_operand.vmem [shape: f32[16,128], index: 0, kind: input, shape index: {}]   ;;  %s347_s1 = inlined_call_operand.vmem [shape: f32[32,16], index: 1, kind: input, shape index: {}]   ;;  %s348_s2 = inlined_call_operand.hbm [shape: f32[128,256], index: 2, kind: input, shape index: {}]   ;;  %s349_s3 = inlined_call_operand.hbm [shape: f32[32,256], index: 3, kind: output, shape index: {}]  }
   0x1   :  { %9 = vsyncpa [#allocation4], 0  ;;  %s18_s14 = sshll.u32 %s348_s2, 4  ;;  %s288_s15 = smov [#allocation2]   ;;  %s19_s14 = int_to_ptr.hbm [resolvable:$true] %s18_s14 }
   0x2   :  { %s20_s16 = sshll.u32 %s288_s15, 4  ;;  %s289_s17 = smov 256   ;;  %s21_s16 = int_to_ptr.vmem [resolvable:$true] %s20_s16 }
   0x3   :  { %s290_s18 = smov 16  }
   0x4   :  { %26 = dma.hbm_to_vmem [thread:$0]  %s19_s14, 4096, %s21_s16, [#allocation3], %s289_s17, %s289_s17, %s290_s18  }
   0x5   :  { %284 = dma.done.wait [#allocation3], 4096  }
   0x6   :  { %285 = vsyncadd [#allocation3], 4294963200  ;;  %v32_v0 = vld [vmem:[%s346_s0 + $0x8] sm:$0xff]  ;;  %v31_v1 = vld [vmem:[%s346_s0] sm:$0xff]  ;;  %vm37_vm0 = vcmask 130048   ;;  %s183_s5 = sshll.u32 %s349_s3, 4  ;;  %s184_s5 = int_to_ptr.hbm [resolvable:$true] %s183_s5 }
   0x7   :  { %64 = vmatpush.msra.mxu0 %v32_v0  ;;  %v33_v2 = vld [vmem:[%s347_s1] sm:$0xff]  ;;  %v109_v3 = vld [vmem:[#allocation2 + $0xf0] sm:$0xff]  ;;  %v110_v4 = vld [vmem:[#allocation2 + $0xf8] sm:$0xff] }
   0x8   :  { %v107_v5 = vld [vmem:[#allocation2 + $0xe0] sm:$0xff]  ;;  %111 = vmatpush.msra.mxu1 %v109_v3  ;;  %v108_v6 = vld [vmem:[#allocation2 + $0xe8] sm:$0xff]  ;;  %v105_v7 = vld [vmem:[#allocation2 + $0xd0] sm:$0xff]  ;;  %200 = vmatpush.msra.mxu3 %v109_v3 }
   0x9   :  { %65 = vmatpush.msra.mxu0 %v31_v1  ;;  %v106_v8 = vld [vmem:[#allocation2 + $0xd8] sm:$0xff]  ;;  %v103_v9 = vld [vmem:[#allocation2 + $0xc0] sm:$0xff]  ;;  %216 = vmatpush.msra.mxu2 %v110_v4  ;;  %v104_v10 = vld [vmem:[#allocation2 + $0xc8] sm:$0xff] }
   0xa   :  { %196 = vmatmul.msk.f32.vlgmr.msra.gmra.mxu0 %vm37_vm0, %v33_v2  ;;  %112 = vmatpush.msra.mxu1 %v107_v5  ;;  %v101_v11 = vld [vmem:[#allocation2 + $0xb0] sm:$0xff]  ;;  %v34_v12 = vld [vmem:[%s347_s1 + $0x8] sm:$0xff]  ;;  %v102_v13 = vld [vmem:[#allocation2 + $0xb8] sm:$0xff] }
   0xb   :  { %140 = vmatpush.msrb.mxu0 %v110_v4  ;;  %201 = vmatpush.msra.mxu3 %v107_v5  ;;  %v99_v14 = vld [vmem:[#allocation2 + $0xa0] sm:$0xff]  ;;  %v100_v15 = vld [vmem:[#allocation2 + $0xa8] sm:$0xff]  ;;  %v97_v16 = vld [vmem:[#allocation2 + $0x90] sm:$0xff] }
   0xc   :  { %113 = vmatpush.msra.mxu1 %v105_v7  ;;  %217 = vmatpush.msra.mxu2 %v108_v6  ;;  %v98_v17 = vld [vmem:[#allocation2 + $0x98] sm:$0xff]  ;;  %v95_v18 = vld [vmem:[#allocation2 + $0x80] sm:$0xff]  ;;  %v96_v19 = vld [vmem:[#allocation2 + $0x88] sm:$0xff] }
   0xd   :  { %141 = vmatpush.msrb.mxu0 %v108_v6  ;;  %202 = vmatpush.msra.mxu3 %v105_v7  ;;  %v93_v20 = vld [vmem:[#allocation2 + $0x70] sm:$0xff]  ;;  %v94_v22 = vld [vmem:[#allocation2 + $0x78] sm:$0xff]  ;;  %v91_v23 = vld [vmem:[#allocation2 + $0x60] sm:$0xff] }
   0xe   :  { %114 = vmatpush.msra.mxu1 %v103_v9  ;;  %218 = vmatpush.msra.mxu2 %v106_v8  ;;  %v35_v21 = vld [vmem:[%s347_s1 + $0x10] sm:$0xff]  ;;  %v92_v24 = vld [vmem:[#allocation2 + $0x68] sm:$0xff]  ;;  %v90_v26 = vld [vmem:[#allocation2 + $0x58] sm:$0xff] }
   0xf   :  { %142 = vmatpush.msrb.mxu0 %v106_v8  ;;  %203 = vmatpush.msra.mxu3 %v103_v9  ;;  %v89_v25 = vld [vmem:[#allocation2 + $0x50] sm:$0xff]  ;;  %v87_v27 = vld [vmem:[#allocation2 + $0x40] sm:$0xff]  ;;  %v88_v28 = vld [vmem:[#allocation2 + $0x48] sm:$0xff] }
  0x10   :  { %115 = vmatpush.msra.mxu1 %v101_v11  ;;  %219 = vmatpush.msra.mxu2 %v104_v10  ;;  %v85_v29 = vld [vmem:[#allocation2 + $0x30] sm:$0xff]  ;;  %v36_v30 = vld [vmem:[%s347_s1 + $0x18] sm:$0xff]  ;;  %v83_v32 = vld [vmem:[#allocation2 + $0x20] sm:$0xff]  ;;  %s291_s1 = smov [#allocation5]  }
  0x11   :  { %143 = vmatpush.msrb.mxu0 %v104_v10  ;;  %204 = vmatpush.msra.mxu3 %v101_v11  ;;  %v86_v31 = vld [vmem:[#allocation2 + $0x38] sm:$0xff]  ;;  %v84_v33 = vld [vmem:[#allocation2 + $0x28] sm:$0xff]  ;;  %v81_v34 = vld [vmem:[#allocation2 + $0x10] sm:$0xff]  ;;  %s181_s29 = sshll.u32 %s291_s1, 4  ;;  %s182_s29 = int_to_ptr.vmem [resolvable:$true] %s181_s29 }
  0x12   :  { %197 = vmatmul.msk.f32.gmra.mxu0 %vm37_vm0, %v34_v12  ;;  %116 = vmatpush.msra.mxu1 %v99_v14  ;;  %v82_v35 = vld [vmem:[#allocation2 + $0x18] sm:$0xff]  ;;  %v79_v36 = vld [vmem:[#allocation2] sm:$0xff]  ;;  %v80_v37 = vld [vmem:[#allocation2 + $0x8] sm:$0xff] }
  0x13   :  { %144 = vmatpush.msrb.mxu0 %v102_v13  ;;  %220 = vmatpush.msra.mxu2 %v102_v13 }
  0x14   :  { %117 = vmatpush.msra.mxu1 %v97_v16  ;;  %205 = vmatpush.msra.mxu3 %v99_v14 }
  0x15   :  { %145 = vmatpush.msrb.mxu0 %v100_v15  ;;  %221 = vmatpush.msra.mxu2 %v100_v15 }
  0x16   :  { %118 = vmatpush.msra.mxu1 %v95_v18  ;;  %206 = vmatpush.msra.mxu3 %v97_v16 }
  0x17   :  { %146 = vmatpush.msrb.mxu0 %v98_v17  ;;  %222 = vmatpush.msra.mxu2 %v98_v17 }
  0x18   :  { %119 = vmatpush.msra.mxu1 %v93_v20  ;;  %207 = vmatpush.msra.mxu3 %v95_v18 }
  0x19   :  { %147 = vmatpush.msrb.mxu0 %v96_v19  ;;  %223 = vmatpush.msra.mxu2 %v96_v19 }
  0x1a   :  { %198 = vmatmul.msk.f32.gmra.mxu0 %vm37_vm0, %v35_v21  ;;  %120 = vmatpush.msra.mxu1 %v91_v23 }
  0x1b   :  { %148 = vmatpush.msrb.mxu0 %v94_v22  ;;  %208 = vmatpush.msra.mxu3 %v93_v20 }
  0x1c   :  { %121 = vmatpush.msra.mxu1 %v89_v25  ;;  %224 = vmatpush.msra.mxu2 %v94_v22 }
  0x1d   :  { %149 = vmatpush.msrb.mxu0 %v92_v24  ;;  %209 = vmatpush.msra.mxu3 %v91_v23 }
  0x1e   :  { %122 = vmatpush.msra.mxu1 %v87_v27  ;;  %225 = vmatpush.msra.mxu2 %v92_v24 }
  0x1f   :  { %150 = vmatpush.msrb.mxu0 %v90_v26  ;;  %210 = vmatpush.msra.mxu3 %v89_v25 }
  0x20   :  { %123 = vmatpush.msra.mxu1 %v85_v29  ;;  %226 = vmatpush.msra.mxu2 %v90_v26 }
  0x21   :  { %151 = vmatpush.msrb.mxu0 %v88_v28  ;;  %211 = vmatpush.msra.mxu3 %v87_v27 }
  0x22   :  { %199 = vmatmul.msk.f32.gmra.mxu0 %vm37_vm0, %v36_v30  ;;  %124 = vmatpush.msra.mxu1 %v83_v32 }
  0x23   :  { %152 = vmatpush.msrb.mxu0 %v86_v31  ;;  %227 = vmatpush.msra.mxu2 %v88_v28 }
  0x24   :  { %125 = vmatpush.msra.mxu1 %v81_v34  ;;  %212 = vmatpush.msra.mxu3 %v85_v29 }
  0x25   :  { %153 = vmatpush.msrb.mxu0 %v84_v33  ;;  %228 = vmatpush.msra.mxu2 %v86_v31 }
  0x26   :  { %213 = vmatpush.msra.mxu3 %v83_v32  ;;  %126 = vmatpush.msra.mxu1 %v79_v36 }
  0x27   :  { %154 = vmatpush.msrb.mxu0 %v82_v35  ;;  %229 = vmatpush.msra.mxu2 %v84_v33 }
  0x28   :  { %214 = vmatpush.msra.mxu3 %v81_v34 }
  0x29   :  { %230 = vmatpush.msra.mxu2 %v82_v35  ;;  %155 = vmatpush.msrb.mxu0 %v80_v37 }
  0x2a   :  { %215 = vmatpush.msra.mxu3 %v79_v36 }
  0x2b   :  { %231 = vmatpush.msra.mxu2 %v80_v37 }
  0x87   :  { %v67_v38 = vpop.f32.mrf.mxu0 }
  0x88   :  { %127 = vmatmul.f32.vlgmr.msra.gmra.mxu1 %v67_v38  ;;  %156 = vmatmul.f32.vlgmr.msrb.gmra.mxu0 %v67_v38 }
  0x8f   :  { %v70_v39 = vpop.f32.mrf.mxu0 }
  0x90   :  { %130 = vmatmul.f32.vlgmr.msra.gmra.mxu3 %v70_v39  ;;  %159 = vmatmul.f32.vlgmr.msra.gmra.mxu2 %v70_v39 }
  0x97   :  { %v73_v40 = vpop.f32.mrf.mxu0 }
  0x98   :  { %133 = vmatmul.f32.gmra.mxu3 %v73_v40  ;;  %162 = vmatmul.f32.gmra.mxu2 %v73_v40 }
  0x9f   :  { %v76_v41 = vpop.f32.mrf.mxu0 }
  0xa0   :  { %136 = vmatmul.f32.gmra.mxu3 %v76_v41  ;;  %165 = vmatmul.f32.gmra.mxu2 %v76_v41 }
 0x105   :  { %v128_v42 = vpop.f32.mrf.mxu1  ;;  %v157_v43 = vpop.f32.mrf.mxu0 }
 0x106   :  { %169 = vst [vmem:[#allocation5] sm:$0xff] %v128_v42 }
 0x107   :  { %170 = vst [vmem:[#allocation5 + $0x8] sm:$0xff] %v157_v43 }
 0x113   :  { %v131_v44 = vpop.f32.mrf.mxu3  ;;  %v160_v45 = vpop.f32.mrf.mxu2 }
 0x114   :  { %171 = vst [vmem:[#allocation5 + $0x10] sm:$0xff] %v131_v44 }
 0x115   :  { %172 = vst [vmem:[#allocation5 + $0x18] sm:$0xff] %v160_v45 }
 0x11b   :  { %v134_v46 = vpop.f32.mrf.mxu3  ;;  %v163_v47 = vpop.f32.mrf.mxu2 }
 0x11c   :  { %173 = vst [vmem:[#allocation5 + $0x20] sm:$0xff] %v134_v46 }
 0x11d   :  { %174 = vst [vmem:[#allocation5 + $0x28] sm:$0xff] %v163_v47 }
 0x123   :  { %v137_v48 = vpop.f32.mrf.mxu3  ;;  %v166_v49 = vpop.f32.mrf.mxu2 }
 0x124   :  { %175 = vst [vmem:[#allocation5 + $0x30] sm:$0xff] %v137_v48 }
 0x125   :  { %176 = vst [vmem:[#allocation5 + $0x38] sm:$0xff] %v166_v49 }
 0x126   :  { %189 = dma.vmem_to_hbm [thread:$0]  %s182_s29, 1024, %s184_s5, [#allocation4], %s289_s17, %s289_s17, %s290_s18  }
 0x127   :  { %286 = dma.done.wait [#allocation4], 1024  }
 0x128   :  { %287 = vsyncadd [#allocation4], 4294966272 }
 0x129   :  { %194 = vsyncpa [#allocation3], 1 }
 0x12a   :  { %195 = vsyncpa [#allocation4], 1 }

// kernel: tpu_custom_call.1
= control target key start
LH: loop header
LB: loop body
LE: loop exit
PB: predicated region body
PF: predicated region fallthrough
CT: control target
= control target key end

     0   :  { %8 = vsyncpa [#allocation3], 0  ;;  %s346_s0 = inlined_call_operand.vmem [shape: f32[16,128], index: 0, kind: input, shape index: {}]   ;;  %s347_s1 = inlined_call_operand.vmem [shape: f32[32,16], index: 1, kind: input, shape index: {}]   ;;  %s348_s2 = inlined_call_operand.hbm [shape: f32[128,256], index: 2, kind: input, shape index: {}]   ;;  %s349_s3 = inlined_call_operand.hbm [shape: f32[32,256], index: 3, kind: output, shape index: {}]  }
   0x1   :  { %9 = vsyncpa [#allocation4], 0  ;;  %s18_s14 = sshll.u32 %s348_s2, 4  ;;  %s288_s15 = smov [#allocation2]   ;;  %s19_s14 = int_to_ptr.hbm [resolvable:$true] %s18_s14 }
   0x2   :  { %s20_s16 = sshll.u32 %s288_s15, 4  ;;  %s289_s17 = smov 256   ;;  %s21_s16 = int_to_ptr.vmem [resolvable:$true] %s20_s16 }
   0x3   :  { %s290_s18 = smov 16  }
   0x4   :  { %26 = dma.hbm_to_vmem [thread:$0]  %s19_s14, 4096, %s21_s16, [#allocation3], %s289_s17, %s289_s17, %s290_s18  }
   0x5   :  { %284 = dma.done.wait [#allocation3], 4096  }
   0x6   :  { %285 = vsyncadd [#allocation3], 4294963200  ;;  %v32_v0 = vld [vmem:[%s346_s0 + $0x8] sm:$0xff]  ;;  %v31_v1 = vld [vmem:[%s346_s0] sm:$0xff]  ;;  %vm37_vm0 = vcmask 130048   ;;  %s183_s5 = sshll.u32 %s349_s3, 4  ;;  %s184_s5 = int_to_ptr.hbm [resolvable:$true] %s183_s5 }
   0x7   :  { %64 = vmatpush.msra.mxu0 %v32_v0  ;;  %v33_v2 = vld [vmem:[%s347_s1] sm:$0xff]  ;;  %v109_v3 = vld [vmem:[#allocation2 + $0xf0] sm:$0xff]  ;;  %v110_v4 = vld [vmem:[#allocation2 + $0xf8] sm:$0xff] }
   0x8   :  { %v107_v5 = vld [vmem:[#allocation2 + $0xe0] sm:$0xff]  ;;  %111 = vmatpush.msra.mxu1 %v109_v3  ;;  %v108_v6 = vld [vmem:[#allocation2 + $0xe8] sm:$0xff]  ;;  %v105_v7 = vld [vmem:[#allocation2 + $0xd0] sm:$0xff]  ;;  %200 = vmatpush.msra.mxu3 %v109_v3 }
   0x9   :  { %65 = vmatpush.msra.mxu0 %v31_v1  ;;  %v106_v8 = vld [vmem:[#allocation2 + $0xd8] sm:$0xff]  ;;  %v103_v9 = vld [vmem:[#allocation2 + $0xc0] sm:$0xff]  ;;  %216 = vmatpush.msra.mxu2 %v110_v4  ;;  %v104_v10 = vld [vmem:[#allocation2 + $0xc8] sm:$0xff] }
   0xa   :  { %196 = vmatmul.msk.f32.vlgmr.msra.gmra.mxu0 %vm37_vm0, %v33_v2  ;;  %112 = vmatpush.msra.mxu1 %v107_v5  ;;  %v101_v11 = vld [vmem:[#allocation2 + $0xb0] sm:$0xff]  ;;  %v34_v12 = vld [vmem:[%s347_s1 + $0x8] sm:$0xff]  ;;  %v102_v13 = vld [vmem:[#allocation2 + $0xb8] sm:$0xff] }
   0xb   :  { %140 = vmatpush.msrb.mxu0 %v110_v4  ;;  %201 = vmatpush.msra.mxu3 %v107_v5  ;;  %v99_v14 = vld [vmem:[#allocation2 + $0xa0] sm:$0xff]  ;;  %v100_v15 = vld [vmem:[#allocation2 + $0xa8] sm:$0xff]  ;;  %v97_v16 = vld [vmem:[#allocation2 + $0x90] sm:$0xff] }
   0xc   :  { %113 = vmatpush.msra.mxu1 %v105_v7  ;;  %217 = vmatpush.msra.mxu2 %v108_v6  ;;  %v98_v17 = vld [vmem:[#allocation2 + $0x98] sm:$0xff]  ;;  %v95_v18 = vld [vmem:[#allocation2 + $0x80] sm:$0xff]  ;;  %v96_v19 = vld [vmem:[#allocation2 + $0x88] sm:$0xff] }
   0xd   :  { %141 = vmatpush.msrb.mxu0 %v108_v6  ;;  %202 = vmatpush.msra.mxu3 %v105_v7  ;;  %v93_v20 = vld [vmem:[#allocation2 + $0x70] sm:$0xff]  ;;  %v94_v22 = vld [vmem:[#allocation2 + $0x78] sm:$0xff]  ;;  %v91_v23 = vld [vmem:[#allocation2 + $0x60] sm:$0xff] }
   0xe   :  { %114 = vmatpush.msra.mxu1 %v103_v9  ;;  %218 = vmatpush.msra.mxu2 %v106_v8  ;;  %v35_v21 = vld [vmem:[%s347_s1 + $0x10] sm:$0xff]  ;;  %v92_v24 = vld [vmem:[#allocation2 + $0x68] sm:$0xff]  ;;  %v90_v26 = vld [vmem:[#allocation2 + $0x58] sm:$0xff] }
   0xf   :  { %142 = vmatpush.msrb.mxu0 %v106_v8  ;;  %203 = vmatpush.msra.mxu3 %v103_v9  ;;  %v89_v25 = vld [vmem:[#allocation2 + $0x50] sm:$0xff]  ;;  %v87_v27 = vld [vmem:[#allocation2 + $0x40] sm:$0xff]  ;;  %v88_v28 = vld [vmem:[#allocation2 + $0x48] sm:$0xff] }
  0x10   :  { %115 = vmatpush.msra.mxu1 %v101_v11  ;;  %219 = vmatpush.msra.mxu2 %v104_v10  ;;  %v85_v29 = vld [vmem:[#allocation2 + $0x30] sm:$0xff]  ;;  %v36_v30 = vld [vmem:[%s347_s1 + $0x18] sm:$0xff]  ;;  %v83_v32 = vld [vmem:[#allocation2 + $0x20] sm:$0xff]  ;;  %s291_s1 = smov [#allocation5]  }
  0x11   :  { %143 = vmatpush.msrb.mxu0 %v104_v10  ;;  %204 = vmatpush.msra.mxu3 %v101_v11  ;;  %v86_v31 = vld [vmem:[#allocation2 + $0x38] sm:$0xff]  ;;  %v84_v33 = vld [vmem:[#allocation2 + $0x28] sm:$0xff]  ;;  %v81_v34 = vld [vmem:[#allocation2 + $0x10] sm:$0xff]  ;;  %s181_s29 = sshll.u32 %s291_s1, 4  ;;  %s182_s29 = int_to_ptr.vmem [resolvable:$true] %s181_s29 }
  0x12   :  { %197 = vmatmul.msk.f32.gmra.mxu0 %vm37_vm0, %v34_v12  ;;  %116 = vmatpush.msra.mxu1 %v99_v14  ;;  %v82_v35 = vld [vmem:[#allocation2 + $0x18] sm:$0xff]  ;;  %v79_v36 = vld [vmem:[#allocation2] sm:$0xff]  ;;  %v80_v37 = vld [vmem:[#allocation2 + $0x8] sm:$0xff] }
  0x13   :  { %144 = vmatpush.msrb.mxu0 %v102_v13  ;;  %220 = vmatpush.msra.mxu2 %v102_v13 }
  0x14   :  { %117 = vmatpush.msra.mxu1 %v97_v16  ;;  %205 = vmatpush.msra.mxu3 %v99_v14 }
  0x15   :  { %145 = vmatpush.msrb.mxu0 %v100_v15  ;;  %221 = vmatpush.msra.mxu2 %v100_v15 }
  0x16   :  { %118 = vmatpush.msra.mxu1 %v95_v18  ;;  %206 = vmatpush.msra.mxu3 %v97_v16 }
  0x17   :  { %146 = vmatpush.msrb.mxu0 %v98_v17  ;;  %222 = vmatpush.msra.mxu2 %v98_v17 }
  0x18   :  { %119 = vmatpush.msra.mxu1 %v93_v20  ;;  %207 = vmatpush.msra.mxu3 %v95_v18 }
  0x19   :  { %147 = vmatpush.msrb.mxu0 %v96_v19  ;;  %223 = vmatpush.msra.mxu2 %v96_v19 }
  0x1a   :  { %198 = vmatmul.msk.f32.gmra.mxu0 %vm37_vm0, %v35_v21  ;;  %120 = vmatpush.msra.mxu1 %v91_v23 }
  0x1b   :  { %148 = vmatpush.msrb.mxu0 %v94_v22  ;;  %208 = vmatpush.msra.mxu3 %v93_v20 }
  0x1c   :  { %121 = vmatpush.msra.mxu1 %v89_v25  ;;  %224 = vmatpush.msra.mxu2 %v94_v22 }
  0x1d   :  { %149 = vmatpush.msrb.mxu0 %v92_v24  ;;  %209 = vmatpush.msra.mxu3 %v91_v23 }
  0x1e   :  { %122 = vmatpush.msra.mxu1 %v87_v27  ;;  %225 = vmatpush.msra.mxu2 %v92_v24 }
  0x1f   :  { %150 = vmatpush.msrb.mxu0 %v90_v26  ;;  %210 = vmatpush.msra.mxu3 %v89_v25 }
  0x20   :  { %123 = vmatpush.msra.mxu1 %v85_v29  ;;  %226 = vmatpush.msra.mxu2 %v90_v26 }
  0x21   :  { %151 = vmatpush.msrb.mxu0 %v88_v28  ;;  %211 = vmatpush.msra.mxu3 %v87_v27 }
  0x22   :  { %199 = vmatmul.msk.f32.gmra.mxu0 %vm37_vm0, %v36_v30  ;;  %124 = vmatpush.msra.mxu1 %v83_v32 }
  0x23   :  { %152 = vmatpush.msrb.mxu0 %v86_v31  ;;  %227 = vmatpush.msra.mxu2 %v88_v28 }
  0x24   :  { %125 = vmatpush.msra.mxu1 %v81_v34  ;;  %212 = vmatpush.msra.mxu3 %v85_v29 }
  0x25   :  { %153 = vmatpush.msrb.mxu0 %v84_v33  ;;  %228 = vmatpush.msra.mxu2 %v86_v31 }
  0x26   :  { %213 = vmatpush.msra.mxu3 %v83_v32  ;;  %126 = vmatpush.msra.mxu1 %v79_v36 }
  0x27   :  { %154 = vmatpush.msrb.mxu0 %v82_v35  ;;  %229 = vmatpush.msra.mxu2 %v84_v33 }
  0x28   :  { %214 = vmatpush.msra.mxu3 %v81_v34 }
  0x29   :  { %230 = vmatpush.msra.mxu2 %v82_v35  ;;  %155 = vmatpush.msrb.mxu0 %v80_v37 }
  0x2a   :  { %215 = vmatpush.msra.mxu3 %v79_v36 }
  0x2b   :  { %231 = vmatpush.msra.mxu2 %v80_v37 }
  0x87   :  { %v67_v38 = vpop.f32.mrf.mxu0 }
  0x88   :  { %127 = vmatmul.f32.vlgmr.msra.gmra.mxu1 %v67_v38  ;;  %156 = vmatmul.f32.vlgmr.msrb.gmra.mxu0 %v67_v38 }
  0x8f   :  { %v70_v39 = vpop.f32.mrf.mxu0 }
  0x90   :  { %130 = vmatmul.f32.vlgmr.msra.gmra.mxu3 %v70_v39  ;;  %159 = vmatmul.f32.vlgmr.msra.gmra.mxu2 %v70_v39 }
  0x97   :  { %v73_v40 = vpop.f32.mrf.mxu0 }
  0x98   :  { %133 = vmatmul.f32.gmra.mxu3 %v73_v40  ;;  %162 = vmatmul.f32.gmra.mxu2 %v73_v40 }
  0x9f   :  { %v76_v41 = vpop.f32.mrf.mxu0 }
  0xa0   :  { %136 = vmatmul.f32.gmra.mxu3 %v76_v41  ;;  %165 = vmatmul.f32.gmra.mxu2 %v76_v41 }
 0x105   :  { %v128_v42 = vpop.f32.mrf.mxu1  ;;  %v157_v43 = vpop.f32.mrf.mxu0 }
 0x106   :  { %169 = vst [vmem:[#allocation5] sm:$0xff] %v128_v42 }
 0x107   :  { %170 = vst [vmem:[#allocation5 + $0x8] sm:$0xff] %v157_v43 }
 0x113   :  { %v131_v44 = vpop.f32.mrf.mxu3  ;;  %v160_v45 = vpop.f32.mrf.mxu2 }
 0x114   :  { %171 = vst [vmem:[#allocation5 + $0x10] sm:$0xff] %v131_v44 }
 0x115   :  { %172 = vst [vmem:[#allocation5 + $0x18] sm:$0xff] %v160_v45 }
 0x11b   :  { %v134_v46 = vpop.f32.mrf.mxu3  ;;  %v163_v47 = vpop.f32.mrf.mxu2 }
 0x11c   :  { %173 = vst [vmem:[#allocation5 + $0x20] sm:$0xff] %v134_v46 }
 0x11d   :  { %174 = vst [vmem:[#allocation5 + $0x28] sm:$0xff] %v163_v47 }
 0x123   :  { %v137_v48 = vpop.f32.mrf.mxu3  ;;  %v166_v49 = vpop.f32.mrf.mxu2 }
 0x124   :  { %175 = vst [vmem:[#allocation5 + $0x30] sm:$0xff] %v137_v48 }
 0x125   :  { %176 = vst [vmem:[#allocation5 + $0x38] sm:$0xff] %v166_v49 }
 0x126   :  { %189 = dma.vmem_to_hbm [thread:$0]  %s182_s29, 1024, %s184_s5, [#allocation4], %s289_s17, %s289_s17, %s290_s18  }
 0x127   :  { %286 = dma.done.wait [#allocation4], 1024  }
 0x128   :  { %287 = vsyncadd [#allocation4], 4294966272 }
 0x129   :  { %194 = vsyncpa [#allocation3], 1 }
 0x12a   :  { %195 = vsyncpa [#allocation4], 1 }

</bundles_post_ra>
